<compile_context>
chip_gen: v5e
topology: v5e:2x2
jax: 0.10.0
libtpu: 0.0.40
codegen_flags: <defaults>
</compile_context>

<pallas_src>
import functools

import jax
import jax.numpy as jnp
from jax.experimental import pallas as pl
from jax.experimental.pallas import tpu as pltpu

BN_EPS = 1e-5


def _field_output_kernel(x_ref, w1_ref, b1_ref, w2_ref, b2_ref, wh_ref, bh_ref,
                         out_ref, *, out_dim):
    # Shared layer 1: Linear -> ReLU  (eval-mode BN1 folded into w2/b2).
    h = jnp.dot(x_ref[...], w1_ref[...], preferred_element_type=jnp.float32)
    h = jnp.maximum(h + b1_ref[...], 0.0)

    # Shared layer 2: Linear -> ReLU  (eval-mode BN2 folded into the fused head).
    h = jnp.dot(h.astype(w2_ref.dtype), w2_ref[...],
                preferred_element_type=jnp.float32)
    h = jnp.maximum(h + b2_ref[...], 0.0)

    # Fused heads: one lane-dense matmul; cols [0, out_dim) -> distances,
    # [out_dim, 2*out_dim) -> confidence; the rest is zero padding (sliced off
    # by the wrapper, so it can take either branch below).
    y = jnp.dot(h.astype(wh_ref.dtype), wh_ref[...],
                preferred_element_type=jnp.float32) + bh_ref[...]

    # Shared-exp epilogue: a single EUP exp feeds both activations.
    #   softplus(y) = max(y, 0) + log(1 + exp(-|y|))
    #   sigmoid(y)  = r if y >= 0 else 1 - r,  r = 1/(1 + exp(-|y|))
    # (overflow-free for strongly negative logits; halves EUP exp pushes)
    e = jnp.exp(-jnp.abs(y))
    softplus = jnp.maximum(y, 0.0) + jnp.log(1.0 + e)
    r = pl.reciprocal(1.0 + e, approx=True)
    sigmoid = jnp.where(y >= 0.0, r, 1.0 - r)

    # Column selector kept as one (1, head_pad) row (broadcast on the select).
    col = jax.lax.broadcasted_iota(jnp.int32, (1, y.shape[-1]), 1)
    out_ref[...] = jnp.where(col < out_dim, softplus, sigmoid).astype(out_ref.dtype)


def prepare_params(params, *, compute_dtype=jnp.bfloat16):
    """One-time (load-time) prep: fold eval-mode BatchNorms into the following
    Linears, fuse + pad the two heads into a 128-lane slab, cast MXU operands.
    Keep the result around; never redo this per forward call."""
    H = params["w1"].shape[1]
    out_dim = params["wd"].shape[1]

    # BN1 folded into layer-2 Linear (fold in f32, cast last).
    scale1 = params["g1"] * jax.lax.rsqrt(params["v1"] + BN_EPS)     # [1, H]
    shift1 = params["be1"] - params["m1"] * scale1
    w2f = params["w2"] * scale1.reshape(H, 1)
    b2f = params["b2"] + shift1 @ params["w2"]

    # BN2 folded into the fused (distances ++ confidence) head.
    scale2 = params["g2"] * jax.lax.rsqrt(params["v2"] + BN_EPS)
    shift2 = params["be2"] - params["m2"] * scale2
    wh = jnp.concatenate([params["wd"], params["wc"]], axis=1)       # [H, 2*out]
    bh = jnp.concatenate([params["bd"], params["bc"]], axis=1)       # [1, 2*out]
    whf = wh * scale2.reshape(H, 1)
    bhf = bh + shift2 @ wh

    # Pad the fused head to a 128-lane multiple -> unmasked lane-dense stores.
    head_pad = max(128, ((2 * out_dim + 127) // 128) * 128)
    whf = jnp.pad(whf, ((0, 0), (0, head_pad - 2 * out_dim)))
    bhf = jnp.pad(bhf, ((0, 0), (0, head_pad - 2 * out_dim)))

    prep = {
        "w1": params["w1"].astype(compute_dtype),
        "b1": params["b1"].astype(jnp.float32),
        "w2": w2f.astype(compute_dtype),
        "b2": b2f.astype(jnp.float32),
        "wh": whf.astype(compute_dtype),
        "bh": bhf.astype(jnp.float32),
    }
    return jax.block_until_ready(prep)


def make_continuous_field_output(params, *, tile_m=128,
                                 compute_dtype=jnp.bfloat16):
    """Returns a jitted fn: x [B, input_dim] f32 -> (distances, confidence),
    each [B, out_dim] f32. For large B, pass tile_m=512..1024 (keep the tile
    count even on v7x so both TensorCores stay busy)."""
    prep = prepare_params(params, compute_dtype=compute_dtype)
    input_dim, H = params["w1"].shape
    out_dim = params["wd"].shape[1]
    head_pad = prep["wh"].shape[1]

    def fwd(x):
        B = x.shape[0]
        n_tiles = pl.cdiv(B, tile_m)            # B=200, tile_m=128 -> 2 tiles
        const = lambda i: (0, 0)
        grid_spec = pltpu.PrefetchScalarGridSpec(
            num_scalar_prefetch=0,
            grid=(n_tiles,),
            in_specs=[
                pl.BlockSpec((tile_m, input_dim), lambda i: (i, 0)),  # x (streamed)
                pl.BlockSpec((input_dim, H), const),                  # w1 (resident)
                pl.BlockSpec((1, H), const),                          # b1
                pl.BlockSpec((H, H), const),                          # w2 (BN1 folded)
                pl.BlockSpec((1, H), const),                          # b2
                pl.BlockSpec((H, head_pad), const),                   # fused head W
                pl.BlockSpec((1, head_pad), const),                   # fused head b
            ],
            out_specs=pl.BlockSpec((tile_m, head_pad), lambda i: (i, 0)),
        )
        # Output dtype follows the compute dtype: bf16 on the fast path halves
        # the dominant HBM store stream; f32 kept for the tight-accuracy path.
        fused = pl.pallas_call(
            functools.partial(_field_output_kernel, out_dim=out_dim),
            out_shape=jax.ShapeDtypeStruct((B, head_pad), compute_dtype),
            grid_spec=grid_spec,
            compiler_params=pltpu.CompilerParams(
                dimension_semantics=("parallel",)),
        )(x.astype(compute_dtype), prep["w1"], prep["b1"], prep["w2"],
          prep["b2"], prep["wh"], prep["bh"])

        distances = fused[:, :out_dim].astype(jnp.float32)
        confidence = fused[:, out_dim:2 * out_dim].astype(jnp.float32)
        return distances, confidence

    return jax.jit(fwd)


def make_params(key, input_dim, hidden_dim, output_dim):
    ks = jax.random.split(key, 12)
    u = lambda k, shape, s=0.1: (jax.random.uniform(k, shape, jnp.float32) * 2.0 - 1.0) * s
    params = {
        # shared layer 1
        "w1": u(ks[0], (input_dim, hidden_dim)),
        "b1": u(ks[1], (1, hidden_dim)),
        "g1": 1.0 + u(ks[2], (1, hidden_dim)),
        "be1": u(ks[3], (1, hidden_dim)),
        "m1": u(ks[4], (1, hidden_dim)),
        "v1": 1.0 + 0.5 * jax.random.uniform(ks[5], (1, hidden_dim), jnp.float32),
        # shared layer 2
        "w2": u(ks[6], (hidden_dim, hidden_dim)),
        "b2": u(ks[7], (1, hidden_dim)),
        "g2": 1.0 + u(ks[8], (1, hidden_dim)),
        "be2": u(ks[9], (1, hidden_dim)),
        "m2": u(ks[10], (1, hidden_dim)),
        "v2": 1.0 + 0.5 * jax.random.uniform(ks[11], (1, hidden_dim), jnp.float32),
    }
    kd, kdb, kc, kcb = jax.random.split(jax.random.fold_in(key, 123), 4)
    params["wd"] = u(kd, (hidden_dim, output_dim))
    params["bd"] = u(kdb, (1, output_dim))
    params["wc"] = u(kc, (hidden_dim, output_dim))
    params["bc"] = u(kcb, (1, output_dim))
    return params


def reference(x, p):
    """Pure-f32 eval-mode reference (explicit BatchNorm, unfused heads)."""
    def bn(h, g, be, m, v):
        return (h - m) * (g / jnp.sqrt(v + BN_EPS)) + be
    h = jnp.maximum(x @ p["w1"] + p["b1"], 0.0)
    h = bn(h, p["g1"], p["be1"], p["m1"], p["v1"])
    h = jnp.maximum(h @ p["w2"] + p["b2"], 0.0)
    h = bn(h, p["g2"], p["be2"], p["m2"], p["v2"])
    d = jax.nn.softplus(h @ p["wd"] + p["bd"])
    c = jax.nn.sigmoid(h @ p["wc"] + p["bc"])
    return d, c


if __name__ == "__main__":
    key = jax.random.PRNGKey(0)
    B, input_dim, hidden_dim, output_dim = 200, 32, 128, 16

    kx, kp = jax.random.split(key)
    x = jax.random.normal(kx, (B, input_dim), jnp.float32)
    params = make_params(kp, input_dim, hidden_dim, output_dim)

    dist_ref, conf_ref = reference(x, params)

    # f32 MXU path: tight correctness check (approx reciprocal -> ~1e-3 slack).
    fwd_f32 = make_continuous_field_output(params, compute_dtype=jnp.float32)
    d32, c32 = jax.block_until_ready(fwd_f32(x))
    assert d32.shape == (B, output_dim) and c32.shape == (B, output_dim)
    assert jnp.allclose(d32, dist_ref, atol=3e-3, rtol=3e-3)
    assert jnp.allclose(c32, conf_ref, atol=3e-3, rtol=3e-3)

    # bf16 MXU + bf16 output path (default fast path; the one to ship on v5e/
    # v6e/v7x): loose check.
    fwd_bf16 = make_continuous_field_output(params)
    d16, c16 = jax.block_until_ready(fwd_bf16(x))
    assert d16.shape == (B, output_dim) and c16.shape == (B, output_dim)
    assert jnp.allclose(d16, dist_ref, atol=8e-2, rtol=8e-2)
    assert jnp.allclose(c16, conf_ref, atol=8e-2, rtol=8e-2)

    print("KERNEL_OK")
</pallas_src>

<mosaic_0001>
module attributes {stable_mosaic.version = 11 : i64} {
  func.func @_field_output_kernel(%arg0: i32, %arg1: memref<128x32xf32, #tpu.memory_space<vmem>>, %arg2: memref<32x128xf32, #tpu.memory_space<vmem>>, %arg3: memref<1x128xf32, #tpu.memory_space<vmem>>, %arg4: memref<128x128xf32, #tpu.memory_space<vmem>>, %arg5: memref<1x128xf32, #tpu.memory_space<vmem>>, %arg6: memref<128x128xf32, #tpu.memory_space<vmem>>, %arg7: memref<1x128xf32, #tpu.memory_space<vmem>>, %arg8: memref<128x128xf32, #tpu.memory_space<vmem>>) attributes {dimension_semantics = [#tpu.dimension_semantics<parallel>], iteration_bounds = array<i64: 2>, scalar_prefetch = 0 : i64, scratch_operands = 0 : i64, tpu.core_type = #tpu.core_type<tc>, window_params = [{transform_indices = @transform_0, window_bounds = array<i64: 128, 32>}, {pipeline_mode = #tpu.pipeline_mode<synchronous>, transform_indices = @transform_1, window_bounds = array<i64: 32, 128>}, {pipeline_mode = #tpu.pipeline_mode<synchronous>, transform_indices = @transform_2, window_bounds = array<i64: 1, 128>}, {pipeline_mode = #tpu.pipeline_mode<synchronous>, transform_indices = @transform_3, window_bounds = array<i64: 128, 128>}, {pipeline_mode = #tpu.pipeline_mode<synchronous>, transform_indices = @transform_4, window_bounds = array<i64: 1, 128>}, {pipeline_mode = #tpu.pipeline_mode<synchronous>, transform_indices = @transform_5, window_bounds = array<i64: 128, 128>}, {pipeline_mode = #tpu.pipeline_mode<synchronous>, transform_indices = @transform_6, window_bounds = array<i64: 1, 128>}, {transform_indices = @transform_7, window_bounds = array<i64: 128, 128>}]} {
    %c0 = arith.constant 0 : index
    %c0_0 = arith.constant 0 : index
    %0 = vector.load %arg1[%c0, %c0_0] : memref<128x32xf32, #tpu.memory_space<vmem>>, vector<128x32xf32>
    %c0_1 = arith.constant 0 : index
    %c0_2 = arith.constant 0 : index
    %1 = vector.load %arg2[%c0_1, %c0_2] : memref<32x128xf32, #tpu.memory_space<vmem>>, vector<32x128xf32>
    %cst = arith.constant dense<0.000000e+00> : vector<128x128xf32>
    %2 = tpu.matmul %0, %1, %cst {dimension_numbers = #tpu.dot_dimension_numbers<[1], [0], [0], [1], [0, 0, 1, 1], [], []>} : vector<128x32xf32>, vector<32x128xf32>, vector<128x128xf32> -> vector<128x128xf32>
    %c0_3 = arith.constant 0 : index
    %c0_4 = arith.constant 0 : index
    %3 = vector.load %arg3[%c0_3, %c0_4] : memref<1x128xf32, #tpu.memory_space<vmem>>, vector<1x128xf32>
    %4 = vector.broadcast %3 : vector<1x128xf32> to vector<128x128xf32>
    %5 = arith.addf %2, %4 : vector<128x128xf32>
    %cst_5 = arith.constant 0.000000e+00 : f32
    %6 = vector.broadcast %cst_5 : f32 to vector<128x128xf32>
    %7 = arith.maximumf %5, %6 : vector<128x128xf32>
    %c0_6 = arith.constant 0 : index
    %c0_7 = arith.constant 0 : index
    %8 = vector.load %arg4[%c0_6, %c0_7] : memref<128x128xf32, #tpu.memory_space<vmem>>, vector<128x128xf32>
    %cst_8 = arith.constant dense<0.000000e+00> : vector<128x128xf32>
    %9 = tpu.matmul %7, %8, %cst_8 {dimension_numbers = #tpu.dot_dimension_numbers<[1], [0], [0], [1], [0, 0, 1, 1], [], []>} : vector<128x128xf32>, vector<128x128xf32>, vector<128x128xf32> -> vector<128x128xf32>
    %c0_9 = arith.constant 0 : index
    %c0_10 = arith.constant 0 : index
    %10 = vector.load %arg5[%c0_9, %c0_10] : memref<1x128xf32, #tpu.memory_space<vmem>>, vector<1x128xf32>
    %11 = vector.broadcast %10 : vector<1x128xf32> to vector<128x128xf32>
    %12 = arith.addf %9, %11 : vector<128x128xf32>
    %cst_11 = arith.constant 0.000000e+00 : f32
    %13 = vector.broadcast %cst_11 : f32 to vector<128x128xf32>
    %14 = arith.maximumf %12, %13 : vector<128x128xf32>
    %c0_12 = arith.constant 0 : index
    %c0_13 = arith.constant 0 : index
    %15 = vector.load %arg6[%c0_12, %c0_13] : memref<128x128xf32, #tpu.memory_space<vmem>>, vector<128x128xf32>
    %cst_14 = arith.constant dense<0.000000e+00> : vector<128x128xf32>
    %16 = tpu.matmul %14, %15, %cst_14 {dimension_numbers = #tpu.dot_dimension_numbers<[1], [0], [0], [1], [0, 0, 1, 1], [], []>} : vector<128x128xf32>, vector<128x128xf32>, vector<128x128xf32> -> vector<128x128xf32>
    %c0_15 = arith.constant 0 : index
    %c0_16 = arith.constant 0 : index
    %17 = vector.load %arg7[%c0_15, %c0_16] : memref<1x128xf32, #tpu.memory_space<vmem>>, vector<1x128xf32>
    %18 = vector.broadcast %17 : vector<1x128xf32> to vector<128x128xf32>
    %19 = arith.addf %16, %18 : vector<128x128xf32>
    %20 = math.absf %19 : vector<128x128xf32>
    %cst_17 = arith.constant 0.000000e+00 : f32
    %21 = vector.broadcast %cst_17 : f32 to vector<128x128xf32>
    %22 = arith.subf %21, %20 : vector<128x128xf32>
    %23 = math.exp %22 : vector<128x128xf32>
    %cst_18 = arith.constant 0.000000e+00 : f32
    %24 = vector.broadcast %cst_18 : f32 to vector<128x128xf32>
    %25 = arith.maximumf %19, %24 : vector<128x128xf32>
    %cst_19 = arith.constant 1.000000e+00 : f32
    %26 = vector.broadcast %cst_19 : f32 to vector<128x128xf32>
    %27 = arith.addf %26, %23 : vector<128x128xf32>
    %28 = math.log %27 : vector<128x128xf32>
    %29 = arith.addf %25, %28 : vector<128x128xf32>
    %cst_20 = arith.constant 1.000000e+00 : f32
    %30 = vector.broadcast %cst_20 : f32 to vector<128x128xf32>
    %31 = arith.addf %30, %23 : vector<128x128xf32>
    %32 = tpu.reciprocal %31 {approx = true} : vector<128x128xf32> -> vector<128x128xf32>
    %cst_21 = arith.constant 0.000000e+00 : f32
    %33 = vector.broadcast %cst_21 : f32 to vector<128x128xf32>
    %34 = arith.cmpf oge, %19, %33 : vector<128x128xf32>
    %cst_22 = arith.constant 1.000000e+00 : f32
    %35 = vector.broadcast %cst_22 : f32 to vector<128x128xf32>
    %36 = arith.subf %35, %32 : vector<128x128xf32>
    %37 = arith.select %34, %32, %36 : vector<128x128xi1>, vector<128x128xf32>
    %38 = tpu.iota {dimensions = array<i32: 1>} : vector<1x128xi32>
    %c16_i32 = arith.constant 16 : i32
    %39 = vector.broadcast %c16_i32 : i32 to vector<1x128xi32>
    %40 = arith.cmpi slt, %38, %39 : vector<1x128xi32>
    %41 = vector.shape_cast %40 : vector<1x128xi1> to vector<1x128xi1>
    %42 = vector.broadcast %41 : vector<1x128xi1> to vector<128x128xi1>
    %43 = arith.select %42, %29, %37 : vector<128x128xi1>, vector<128x128xf32>
    %c0_23 = arith.constant 0 : index
    %c0_24 = arith.constant 0 : index
    %44 = vector.load %arg8[%c0_23, %c0_24] : memref<128x128xf32, #tpu.memory_space<vmem>>, vector<128x128xf32>
    tpu.vector_store %arg8[%c0_23, %c0_24], %43 {strides = array<i32>} : memref<128x128xf32, #tpu.memory_space<vmem>>, vector<128x128xf32>,
    return
  }
  func.func @transform_0(%arg0: i32) -> (i32, i32) {
    %c0_i32 = arith.constant 0 : i32
    %c0_i32_0 = arith.constant 0 : i32
    return %arg0, %c0_i32 : i32, i32
  }
  func.func @transform_1(%arg0: i32) -> (i32, i32) {
    %c0_i32 = arith.constant 0 : i32
    %c0_i32_0 = arith.constant 0 : i32
    %c0_i32_1 = arith.constant 0 : i32
    return %c0_i32, %c0_i32_0 : i32, i32
  }
  func.func @transform_2(%arg0: i32) -> (i32, i32) {
    %c0_i32 = arith.constant 0 : i32
    %c0_i32_0 = arith.constant 0 : i32
    %c0_i32_1 = arith.constant 0 : i32
    return %c0_i32, %c0_i32_0 : i32, i32
  }
  func.func @transform_3(%arg0: i32) -> (i32, i32) {
    %c0_i32 = arith.constant 0 : i32
    %c0_i32_0 = arith.constant 0 : i32
    %c0_i32_1 = arith.constant 0 : i32
    return %c0_i32, %c0_i32_0 : i32, i32
  }
  func.func @transform_4(%arg0: i32) -> (i32, i32) {
    %c0_i32 = arith.constant 0 : i32
    %c0_i32_0 = arith.constant 0 : i32
    %c0_i32_1 = arith.constant 0 : i32
    return %c0_i32, %c0_i32_0 : i32, i32
  }
  func.func @transform_5(%arg0: i32) -> (i32, i32) {
    %c0_i32 = arith.constant 0 : i32
    %c0_i32_0 = arith.constant 0 : i32
    %c0_i32_1 = arith.constant 0 : i32
    return %c0_i32, %c0_i32_0 : i32, i32
  }
  func.func @transform_6(%arg0: i32) -> (i32, i32) {
    %c0_i32 = arith.constant 0 : i32
    %c0_i32_0 = arith.constant 0 : i32
    %c0_i32_1 = arith.constant 0 : i32
    return %c0_i32, %c0_i32_0 : i32, i32
  }
  func.func @transform_7(%arg0: i32) -> (i32, i32) {
    %c0_i32 = arith.constant 0 : i32
    %c0_i32_0 = arith.constant 0 : i32
    return %arg0, %c0_i32 : i32, i32
  }
}

</mosaic_0001>

<bundles_post_ra>
// kernel: fwd.1
= control target key start
LH: loop header
LB: loop body
LE: loop exit
PB: predicated region body
PF: predicated region fallthrough
CT: control target
= control target key end

     0   :  { %12 = vsyncpa [#allocation3], 0  ;;  %s1632_s24 = smov 0   ;;  %s1634_s25 = smov 0   ;;  %s2057_s0 = inlined_call_operand.vmem [shape: f32[200,32], index: 0, kind: input, shape index: {}]   ;;  %s2058_s1 = inlined_call_operand.hbm [shape: f32[32,128], index: 1, kind: input, shape index: {}]   ;;  %s2059_s2 = inlined_call_operand.vmem [shape: f32[1,128], index: 2, kind: input, shape index: {}]   ;;  %s2060_s3 = inlined_call_operand.vmem [shape: f32[128,128], index: 3, kind: input, shape index: {}]   ;;  %s2061_s4 = inlined_call_operand.vmem [shape: f32[1,128], index: 4, kind: input, shape index: {}]   ;;  %s2062_s5 = inlined_call_operand.vmem [shape: f32[128,128], index: 5, kind: input, shape index: {}]   ;;  %s2063_s6 = inlined_call_operand.vmem [shape: f32[1,128], index: 6, kind: input, shape index: {}]   ;;  %s2064_s7 = inlined_call_operand.vmem [shape: f32[200,128], index: 7, kind: output, shape index: {}]  }
   0x1   :  { %s1636_s26 = smov 0  }
   0x2 LB: > { %s1645_s27 = sadd.s32 4294967295, %s1555_s26   ;;  %s1647_s28 = sadd.s32 1, %s1555_s26   ;;  %s1555_s26 = sphi %s1636_s26, %s2073_s26   ;;  %s1551_s25 = sphi %s1634_s25, %s2072_s25   ;;  %s1547_s24 = sphi %s1632_s24, %s2071_s24  }
   0x3   : > { %s174_s29 = ssub.s32 %s1555_s26, %s1647_s28  ;;  %s177_s30 = sadd.s32 1, %s1551_s25 }
   0x4   : > { %p175_p0 = scmp.eq.s32.totalorder %s174_s29, 0  ;;  %p187_p1 = scmp.ne.s32.totalorder %s1551_s25, %s1547_s24 }
   0x5   : > { %p188_p2 = scmp.eq.s32.totalorder %s1645_s27, 1  ;;  %p1191_p3 = scmp.ge.s32.totalorder %s1555_s26, 1 }
   0x6   : > { %s1655_s8 = scalar_select %p175_p0, %s1551_s25, %s177_s30  }
   0x7   : > { %p1657_p4 = por %p188_p2, %p187_p1  ;;  %p201_p5 = scmp.lt.s32.totalorder %s1555_s26, 3 }
   0x8   : > { %p1275_p6 = scmp.eq.s32.totalorder %s1645_s27, 0  ;;  %s212_s12 = sshll.u32 %s2058_s1, 4  ;;  %s213_s12 = int_to_ptr.hbm [resolvable:$true] %s212_s12 }
   0x9   : > { %p202_p7 = pnand %p1191_p3, %p201_p5  ;;  %s1589_s13 = smov [#allocation2]  }
   0xa   : > { %s214_s14 = sshll.u32 %s1589_s13, 4  ;;  %s1590_s15 = smov 128   ;;  %s215_s14 = int_to_ptr.vmem [resolvable:$true] %s214_s14 }
   0xb   : > { %p1271_p8 = pneg %p202_p7  ;;  %s1591_s16 = smov 8  }
   0xc   : > { %262 = sbr.rel (%p202_p7) target bundleno = 622 (0x26e), region = 48 }
   0xd   : > { %p1272_p9 = pnand %p1275_p6, %p1271_p8 }
   0xf   : > { %1274 = dma.hbm_to_vmem [thread:$0]  (!%p1272_p9), %s213_s12, 512, %s215_s14, [#allocation3], %s1590_s15, %s1590_s15, %s1591_s16  }
  0x11   : > { %1542 = dma.done.wait (%p1275_p6), [#allocation3], 512  }
  0x12   : > { %1544 = vsyncadd (%p1275_p6), [#allocation3], 4294966784  ;;  %s1672_s17 = sshll.u32 %s1645_s27, 4  ;;  %v336_v0 = vld [vmem:[#allocation2 + $0x18] sm:$0xff]  ;;  %v335_v1 = vld [vmem:[#allocation2 + $0x10] sm:$0xff]  ;;  %vm341_vm0 = vcmask 261120  }
  0x13   : > { %p303_p10 = scmp.lt.s32.totalorder %s1672_s17, 24  ;;  %402 = vmatpush.msra.mxu0 %v336_v0  ;;  %v334_v2 = vld [vmem:[#allocation2 + $0x8] sm:$0xff]  ;;  %v333_v3 = vld [vmem:[#allocation2] sm:$0xff]  ;;  %v486_v13 = vld [vmem:[%s2060_s3 + $0x78] sm:$0xff]  ;;  %s295_s13 = sand.u32 1, %s1547_s24  }
  0x14   : > { %v485_v14 = vld [vmem:[%s2060_s3 + $0x70] sm:$0xff]  ;;  %491 = vmatpush.msra.mxu1 %v486_v13  ;;  %1235 = vmatpush.msra.mxu3 %v486_v13  ;;  %v484_v15 = vld [vmem:[%s2060_s3 + $0x68] sm:$0xff]  ;;  %v483_v17 = vld [vmem:[%s2060_s3 + $0x60] sm:$0xff]  ;;  %s1196_s14 = sshll.u32 %s295_s13, 7  ;;  %s910_s15 = ssub.s32 (%p1657_p4), 25, %s1672_s17 }
  0x15   : > { %s304_s18 = scalar_select %p303_p10, %s1672_s17, 24  ;;  %403 = vmatpush.msra.mxu0 %v335_v1  ;;  %v482_v18 = vld [vmem:[%s2060_s3 + $0x58] sm:$0xff]  ;;  %v481_v19 = vld [vmem:[%s2060_s3 + $0x50] sm:$0xff]  ;;  %v480_v20 = vld [vmem:[%s2060_s3 + $0x48] sm:$0xff] }
  0x16   : > { %492 = vmatpush.msra.mxu1 %v485_v14  ;;  %1236 = vmatpush.msra.mxu3 %v485_v14  ;;  %v479_v22 = vld [vmem:[%s2060_s3 + $0x40] sm:$0xff]  ;;  %v478_v23 = vld [vmem:[%s2060_s3 + $0x38] sm:$0xff]  ;;  %v477_v24 = vld [vmem:[%s2060_s3 + $0x30] sm:$0xff]  ;;  %s1854_s24 = scalar_lea.vmem [#allocation4], %s1196_s14   ;;  %s1232_s16 = sshll.u32 (%p1657_p4), %s1645_s27, 7 }
  0x17   : > { %s1198_s19 = sshll.u32 %s304_s18, 3  ;;  %404 = vmatpush.msra.mxu0 %v334_v2  ;;  %v476_v25 = vld [vmem:[%s2060_s3 + $0x28] sm:$0xff]  ;;  %v475_v27 = vld [vmem:[%s2060_s3 + $0x20] sm:$0xff]  ;;  %v474_v28 = vld [vmem:[%s2060_s3 + $0x18] sm:$0xff]  ;;  %p911_p11 = scmp.lt.s32.totalorder (%p1657_p4), %s910_s15, 16 }
  0x18   : > { %s1679_s22 = scalar_lea.vmem %s2057_s0, %s1198_s19  ;;  %493 = vmatpush.msra.mxu1 %v484_v15  ;;  %1237 = vmatpush.msra.mxu3 %v484_v15  ;;  %v473_v29 = vld [vmem:[%s2060_s3 + $0x10] sm:$0xff]  ;;  %v472_v31 = vld [vmem:[%s2060_s3 + $0x8] sm:$0xff]  ;;  %v471_v32 = vld [vmem:[%s2060_s3] sm:$0xff]  ;;  %s1960_s20 = scalar_lea.vmem (%p1657_p4), %s2064_s7, %s1232_s16  }
  0x19   : > { %v317_v4 = vld [vmem:[%s1679_s22] sm:$0xff]  ;;  %405 = vmatpush.msra.mxu0 %v333_v3  ;;  %v318_v5 = vld [vmem:[%s1679_s22 + $0x8] sm:$0xff]  ;;  %v319_v6 = vld [vmem:[%s1679_s22 + $0x10] sm:$0xff] }
  0x1a   : > { %1199 = vmatmul.msk.f32.vlgmr.msra.gmra.mxu0 %vm341_vm0, %v317_v4  ;;  %v320_v7 = vld [vmem:[%s1679_s22 + $0x18] sm:$0xff]  ;;  %v321_v8 = vld [vmem:[%s1679_s22 + $0x20] sm:$0xff]  ;;  %v322_v9 = vld [vmem:[%s1679_s22 + $0x28] sm:$0xff]  ;;  %494 = vmatpush.msra.mxu1 %v483_v17 }
  0x1b   : > { %v323_v10 = vld [vmem:[%s1679_s22 + $0x30] sm:$0xff]  ;;  %v324_v11 = vld [vmem:[%s1679_s22 + $0x38] sm:$0xff]  ;;  %v325_v12 = vld [vmem:[%s1679_s22 + $0x40] sm:$0xff]  ;;  %1238 = vmatpush.msra.mxu3 %v483_v17 }
  0x1c   : > { %v326_v16 = vld [vmem:[%s1679_s22 + $0x48] sm:$0xff]  ;;  %495 = vmatpush.msra.mxu1 %v482_v18  ;;  %v327_v21 = vld [vmem:[%s1679_s22 + $0x50] sm:$0xff]  ;;  %v328_v26 = vld [vmem:[%s1679_s22 + $0x58] sm:$0xff] }
  0x1d   : > { %1239 = vmatpush.msra.mxu3 %v482_v18  ;;  %v329_v30 = vld [vmem:[%s1679_s22 + $0x60] sm:$0xff]  ;;  %v330_v33 = vld [vmem:[%s1679_s22 + $0x68] sm:$0xff]  ;;  %v331_v34 = vld [vmem:[%s1679_s22 + $0x70] sm:$0xff] }
  0x1e   : > { %496 = vmatpush.msra.mxu1 %v481_v19  ;;  %v332_v35 = vld [vmem:[%s1679_s22 + $0x78] sm:$0xff]  ;;  %v1764_v36 = vld [vmem:[%s2059_s2] ss:$0 sm:$0xff]  ;;  %v586_v3 = vld [vmem:[%s2062_s5 + $0x70] sm:$0xff] }
  0x1f   : > { %1240 = vmatpush.msra.mxu3 %v481_v19  ;;  %v587_v0 = vld [vmem:[%s2062_s5 + $0x78] sm:$0xff]  ;;  %v580_v13 = vld [vmem:[%s2062_s5 + $0x40] sm:$0xff]  ;;  %v578_v17 = vld [vmem:[%s2062_s5 + $0x30] sm:$0xff] }
  0x20   : > { %497 = vmatpush.msra.mxu1 %v480_v20  ;;  %592 = vmatpush.msra.mxu2 %v587_v0  ;;  %v579_v14 = vld [vmem:[%s2062_s5 + $0x38] sm:$0xff]  ;;  %v577_v19 = vld [vmem:[%s2062_s5 + $0x28] sm:$0xff] }
  0x21   : > { %1241 = vmatpush.msra.mxu3 %v480_v20  ;;  %v576_v20 = vld [vmem:[%s2062_s5 + $0x20] sm:$0xff] }
  0x22   : > { %1200 = vmatmul.msk.f32.gmra.mxu0 %vm341_vm0, %v318_v5  ;;  %498 = vmatpush.msra.mxu1 %v479_v22  ;;  %v585_v5 = vld [vmem:[%s2062_s5 + $0x68] sm:$0xff] }
  0x23   : > { %1242 = vmatpush.msra.mxu3 %v479_v22  ;;  %593 = vmatpush.msra.mxu2 %v586_v3 }
  0x24   : > { %499 = vmatpush.msra.mxu1 %v478_v23 }
  0x25   : > { %1243 = vmatpush.msra.mxu3 %v478_v23  ;;  %594 = vmatpush.msra.mxu2 %v585_v5 }
  0x26   : > { %500 = vmatpush.msra.mxu1 %v477_v24 }
  0x27   : > { %1244 = vmatpush.msra.mxu3 %v477_v24  ;;  %v574_v24 = vld [vmem:[%s2062_s5 + $0x10] sm:$0xff] }
  0x28   : > { %501 = vmatpush.msra.mxu1 %v476_v25 }
  0x29   : > { %1245 = vmatpush.msra.mxu3 %v476_v25 }
  0x2a   : > { %1201 = vmatmul.msk.f32.gmra.mxu0 %vm341_vm0, %v319_v6  ;;  %502 = vmatpush.msra.mxu1 %v475_v27  ;;  %v584_v6 = vld [vmem:[%s2062_s5 + $0x60] sm:$0xff] }
  0x2b   : > { %1246 = vmatpush.msra.mxu3 %v475_v27  ;;  %595 = vmatpush.msra.mxu2 %v584_v6  ;;  %v572_v27 = vld [vmem:[%s2062_s5] sm:$0xff] }
  0x2c   : > { %503 = vmatpush.msra.mxu1 %v474_v28 }
  0x2d   : > { %1247 = vmatpush.msra.mxu3 %v474_v28 }
  0x2e   : > { %504 = vmatpush.msra.mxu1 %v473_v29 }
  0x2f   : > { %1248 = vmatpush.msra.mxu3 %v473_v29 }
  0x30   : > { %505 = vmatpush.msra.mxu1 %v472_v31 }
  0x31   : > { %1249 = vmatpush.msra.mxu3 %v472_v31 }
  0x32   : > { %1202 = vmatmul.msk.f32.gmra.mxu0 %vm341_vm0, %v320_v7  ;;  %506 = vmatpush.msra.mxu1 %v471_v32  ;;  %v583_v7 = vld [vmem:[%s2062_s5 + $0x58] sm:$0xff] }
  0x33   : > { %1250 = vmatpush.msra.mxu3 %v471_v32  ;;  %596 = vmatpush.msra.mxu2 %v583_v7 }
  0x35   : > { %1251 = vmatpush.msrb.mxu3 %v587_v0 }
  0x37   : > { %1252 = vmatpush.msrb.mxu3 %v586_v3 }
  0x39   : > { %1253 = vmatpush.msrb.mxu3 %v585_v5 }
  0x3a   : > { %1203 = vmatmul.msk.f32.gmra.mxu0 %vm341_vm0, %v321_v8 }
  0x3b   : > { %1254 = vmatpush.msrb.mxu3 %v584_v6 }
  0x3d   : > { %1255 = vmatpush.msrb.mxu3 %v583_v7 }
  0x42   : > { %1204 = vmatmul.msk.f32.gmra.mxu0 %vm341_vm0, %v322_v9 }
  0x4a   : > { %1205 = vmatmul.msk.f32.gmra.mxu0 %vm341_vm0, %v323_v10  ;;  %v582_v10 = vld [vmem:[%s2062_s5 + $0x50] sm:$0xff] }
  0x4b   : > { %597 = vmatpush.msra.mxu2 %v582_v10  ;;  %1256 = vmatpush.msrb.mxu3 %v582_v10 }
  0x52   : > { %1206 = vmatmul.msk.f32.gmra.mxu0 %vm341_vm0, %v324_v11 }
  0x5a   : > { %1207 = vmatmul.msk.f32.gmra.mxu0 %vm341_vm0, %v325_v12  ;;  %v581_v12 = vld [vmem:[%s2062_s5 + $0x48] sm:$0xff] }
  0x5b   : > { %598 = vmatpush.msra.mxu2 %v581_v12  ;;  %1257 = vmatpush.msrb.mxu3 %v581_v12 }
  0x5d   : > { %599 = vmatpush.msra.mxu2 %v580_v13  ;;  %1258 = vmatpush.msrb.mxu3 %v580_v13 }
  0x5f   : > { %600 = vmatpush.msra.mxu2 %v579_v14  ;;  %1259 = vmatpush.msrb.mxu3 %v579_v14 }
  0x61   : > { %601 = vmatpush.msra.mxu2 %v578_v17  ;;  %1260 = vmatpush.msrb.mxu3 %v578_v17 }
  0x62   : > { %1208 = vmatmul.msk.f32.gmra.mxu0 %vm341_vm0, %v326_v16 }
  0x63   : > { %602 = vmatpush.msra.mxu2 %v577_v19  ;;  %1261 = vmatpush.msrb.mxu3 %v577_v19 }
  0x65   : > { %603 = vmatpush.msra.mxu2 %v576_v20  ;;  %1262 = vmatpush.msrb.mxu3 %v576_v20 }
  0x6a   : > { %1209 = vmatmul.msk.f32.gmra.mxu0 %vm341_vm0, %v327_v21  ;;  %v575_v21 = vld [vmem:[%s2062_s5 + $0x18] sm:$0xff] }
  0x6b   : > { %604 = vmatpush.msra.mxu2 %v575_v21  ;;  %1263 = vmatpush.msrb.mxu3 %v575_v21 }
  0x6d   : > { %605 = vmatpush.msra.mxu2 %v574_v24  ;;  %1264 = vmatpush.msrb.mxu3 %v574_v24 }
  0x72   : > { %1210 = vmatmul.msk.f32.gmra.mxu0 %vm341_vm0, %v328_v26  ;;  %v573_v26 = vld [vmem:[%s2062_s5 + $0x8] sm:$0xff] }
  0x73   : > { %606 = vmatpush.msra.mxu2 %v573_v26  ;;  %1265 = vmatpush.msrb.mxu3 %v573_v26 }
  0x75   : > { %607 = vmatpush.msra.mxu2 %v572_v27  ;;  %1266 = vmatpush.msrb.mxu3 %v572_v27 }
  0x7a   : > { %1211 = vmatmul.msk.f32.gmra.mxu0 %vm341_vm0, %v329_v30 }
  0x82   : > { %1212 = vmatmul.msk.f32.gmra.mxu0 %vm341_vm0, %v330_v33 }
  0x8a   : > { %1213 = vmatmul.msk.f32.gmra.mxu0 %vm341_vm0, %v331_v34 }
  0x92   : > { %1214 = vmatmul.msk.f32.gmra.mxu0 %vm341_vm0, %v332_v35 }
  0x97   : > { %v407_v37 = vpop.f32.mrf.mxu0 }
  0x98   : > { %v408_v38 = vadd.f32 %v1764_v36, %v407_v37 }
  0x9a   : > { %v455_v39 = vmax.f32 %v408_v38, 0.0  ;;  %v1369_v38 = vld [vmem:[%s2061_s4] ss:$0 sm:$0xff] }
  0x9c   : > { %507 = vmatmul.f32.vlgmr.msra.gmra.mxu1 %v455_v39 }
  0x9f   : > { %v410_v40 = vpop.f32.mrf.mxu0 }
  0xa0   : > { %v411_v41 = vadd.f32 %v1764_v36, %v410_v40 }
  0xa2   : > { %v456_v42 = vmax.f32 %v411_v41, 0.0 }
  0xa4   : > { %510 = vmatmul.f32.gmra.mxu1 %v456_v42 }
  0xa7   : > { %v413_v43 = vpop.f32.mrf.mxu0 }
  0xa8   : > { %v414_v44 = vadd.f32 %v1764_v36, %v413_v43 }
  0xaa   : > { %v457_v45 = vmax.f32 %v414_v44, 0.0 }
  0xac   : > { %513 = vmatmul.f32.gmra.mxu1 %v457_v45 }
  0xaf   : > { %v416_v46 = vpop.f32.mrf.mxu0 }
  0xb0   : > { %v417_v47 = vadd.f32 %v1764_v36, %v416_v46 }
  0xb2   : > { %v458_v48 = vmax.f32 %v417_v47, 0.0 }
  0xb4   : > { %516 = vmatmul.f32.gmra.mxu1 %v458_v48 }
  0xb7   : > { %v419_v49 = vpop.f32.mrf.mxu0 }
  0xb8   : > { %v420_v50 = vadd.f32 %v1764_v36, %v419_v49 }
  0xba   : > { %v459_v51 = vmax.f32 %v420_v50, 0.0 }
  0xbc   : > { %519 = vmatmul.f32.gmra.mxu1 %v459_v51 }
  0xbf   : > { %v422_v52 = vpop.f32.mrf.mxu0 }
  0xc0   : > { %v423_v53 = vadd.f32 %v1764_v36, %v422_v52 }
  0xc2   : > { %v460_v54 = vmax.f32 %v423_v53, 0.0 }
  0xc4   : > { %522 = vmatmul.f32.gmra.mxu1 %v460_v54 }
  0xc7   : > { %v425_v55 = vpop.f32.mrf.mxu0 }
  0xc8   : > { %v426_v56 = vadd.f32 %v1764_v36, %v425_v55 }
  0xca   : > { %v461_v57 = vmax.f32 %v426_v56, 0.0 }
  0xcc   : > { %525 = vmatmul.f32.gmra.mxu1 %v461_v57 }
  0xcf   : > { %v428_v58 = vpop.f32.mrf.mxu0 }
  0xd0   : > { %v429_v59 = vadd.f32 %v1764_v36, %v428_v58 }
  0xd2   : > { %v462_v60 = vmax.f32 %v429_v59, 0.0 }
  0xd4   : > { %528 = vmatmul.f32.gmra.mxu1 %v462_v60 }
  0xd7   : > { %v431_v61 = vpop.f32.mrf.mxu0 }
  0xd8   : > { %v432_v62 = vadd.f32 %v1764_v36, %v431_v61 }
  0xda   : > { %v463_v63 = vmax.f32 %v432_v62, 0.0 }
  0xdc   : > { %531 = vmatmul.f32.gmra.mxu1 %v463_v63 }
  0xdf   : > { %v434_v1 = vpop.f32.mrf.mxu0 }
  0xe0   : > { %v435_v2 = vadd.f32 %v1764_v36, %v434_v1 }
  0xe2   : > { %v464_v4 = vmax.f32 %v435_v2, 0.0 }
  0xe4   : > { %534 = vmatmul.f32.gmra.mxu1 %v464_v4 }
  0xe7   : > { %v437_v8 = vpop.f32.mrf.mxu0 }
  0xe8   : > { %v438_v9 = vadd.f32 %v1764_v36, %v437_v8 }
  0xea   : > { %v465_v11 = vmax.f32 %v438_v9, 0.0 }
  0xec   : > { %537 = vmatmul.f32.gmra.mxu1 %v465_v11 }
  0xef   : > { %v440_v15 = vpop.f32.mrf.mxu0 }
  0xf0   : > { %v441_v16 = vadd.f32 %v1764_v36, %v440_v15 }
  0xf2   : > { %v466_v18 = vmax.f32 %v441_v16, 0.0 }
  0xf4   : > { %540 = vmatmul.f32.gmra.mxu1 %v466_v18 }
  0xf7   : > { %v443_v22 = vpop.f32.mrf.mxu0 }
  0xf8   : > { %v444_v23 = vadd.f32 %v1764_v36, %v443_v22  ;;  %v1836_v22 = vld [vmem:[%s2063_s6] ss:$0 sm:$0xff] }
  0xfa   : > { %v467_v25 = vmax.f32 %v444_v23, 0.0 }
  0xfc   : > { %543 = vmatmul.f32.vlgmr.msra.gmra.mxu3 %v467_v25 }
  0xff   : > { %v446_v28 = vpop.f32.mrf.mxu0 }
 0x100   : > { %v447_v29 = vadd.f32 %v1764_v36, %v446_v28 }
 0x102   : > { %v468_v30 = vmax.f32 %v447_v29, 0.0 }
 0x104   : > { %546 = vmatmul.f32.gmra.mxu3 %v468_v30 }
 0x107   : > { %v449_v31 = vpop.f32.mrf.mxu0 }
 0x108   : > { %v450_v32 = vadd.f32 %v1764_v36, %v449_v31 }
 0x10a   : > { %v469_v33 = vmax.f32 %v450_v32, 0.0 }
 0x10c   : > { %549 = vmatmul.f32.gmra.mxu3 %v469_v33 }
 0x10f   : > { %v452_v34 = vpop.f32.mrf.mxu0 }
 0x110   : > { %v453_v35 = vadd.f32 %v1764_v36, %v452_v34 }
 0x112   : > { %v470_v37 = vmax.f32 %v453_v35, 0.0 }
 0x114   : > { %552 = vmatmul.f32.gmra.mxu3 %v470_v37 }
 0x119   : > { %v508_v39 = vpop.f32.mrf.mxu1 }
 0x11a   : > { %v509_v40 = vadd.f32 %v1369_v38, %v508_v39 }
 0x11c   : > { %v556_v41 = vmax.f32 %v509_v40, 0.0 }
 0x11e   : > { %608 = vmatmul.f32.vlgmr.msra.gmra.mxu2 %v556_v41 }
 0x121   : > { %v511_v42 = vpop.f32.mrf.mxu1 }
 0x122   : > { %v512_v43 = vadd.f32 %v1369_v38, %v511_v42 }
 0x124   : > { %v557_v44 = vmax.f32 %v512_v43, 0.0 }
 0x126   : > { %611 = vmatmul.f32.gmra.mxu2 %v557_v44 }
 0x129   : > { %v514_v45 = vpop.f32.mrf.mxu1 }
 0x12a   : > { %v515_v46 = vadd.f32 %v1369_v38, %v514_v45 }
 0x12c   : > { %v558_v47 = vmax.f32 %v515_v46, 0.0 }
 0x12e   : > { %614 = vmatmul.f32.gmra.mxu2 %v558_v47 }
 0x131   : > { %v517_v48 = vpop.f32.mrf.mxu1 }
 0x132   : > { %v518_v36 = vadd.f32 %v1369_v38, %v517_v48 }
 0x134   : > { %v559_v49 = vmax.f32 %v518_v36, 0.0 }
 0x136   : > { %617 = vmatmul.f32.gmra.mxu2 %v559_v49 }
 0x139   : > { %v520_v50 = vpop.f32.mrf.mxu1 }
 0x13a   : > { %v521_v51 = vadd.f32 %v1369_v38, %v520_v50 }
 0x13c   : > { %v560_v52 = vmax.f32 %v521_v51, 0.0 }
 0x13e   : > { %620 = vmatmul.f32.gmra.mxu2 %v560_v52 }
 0x141   : > { %v523_v53 = vpop.f32.mrf.mxu1 }
 0x142   : > { %v524_v54 = vadd.f32 %v1369_v38, %v523_v53 }
 0x144   : > { %v561_v55 = vmax.f32 %v524_v54, 0.0 }
 0x146   : > { %623 = vmatmul.f32.gmra.mxu2 %v561_v55 }
 0x149   : > { %v526_v56 = vpop.f32.mrf.mxu1 }
 0x14a   : > { %v527_v57 = vadd.f32 %v1369_v38, %v526_v56 }
 0x14c   : > { %v562_v58 = vmax.f32 %v527_v57, 0.0 }
 0x14e   : > { %626 = vmatmul.f32.gmra.mxu2 %v562_v58 }
 0x151   : > { %v529_v59 = vpop.f32.mrf.mxu1 }
 0x152   : > { %v530_v60 = vadd.f32 %v1369_v38, %v529_v59 }
 0x154   : > { %v563_v61 = vmax.f32 %v530_v60, 0.0 }
 0x156   : > { %629 = vmatmul.f32.gmra.mxu2 %v563_v61 }
 0x159   : > { %v532_v62 = vpop.f32.mrf.mxu1 }
 0x15a   : > { %v533_v63 = vadd.f32 %v1369_v38, %v532_v62 }
 0x15c   : > { %v564_v0 = vmax.f32 %v533_v63, 0.0 }
 0x15e   : > { %632 = vmatmul.f32.gmra.mxu2 %v564_v0 }
 0x161   : > { %v535_v1 = vpop.f32.mrf.mxu1 }
 0x162   : > { %v536_v2 = vadd.f32 %v1369_v38, %v535_v1 }
 0x164   : > { %v565_v3 = vmax.f32 %v536_v2, 0.0 }
 0x166   : > { %635 = vmatmul.f32.gmra.mxu2 %v565_v3 }
 0x169   : > { %v538_v4 = vpop.f32.mrf.mxu1 }
 0x16a   : > { %v539_v5 = vadd.f32 %v1369_v38, %v538_v4 }
 0x16c   : > { %v566_v6 = vmax.f32 %v539_v5, 0.0 }
 0x16e   : > { %638 = vmatmul.f32.gmra.mxu2 %v566_v6 }
 0x171   : > { %v541_v7 = vpop.f32.mrf.mxu1 }
 0x172   : > { %v542_v8 = vadd.f32 %v1369_v38, %v541_v7 }
 0x174   : > { %v567_v9 = vmax.f32 %v542_v8, 0.0 }
 0x176   : > { %641 = vmatmul.f32.gmra.mxu2 %v567_v9 }
 0x17f   : > { %v544_v10 = vpop.f32.mrf.mxu3 }
 0x180   : > { %v545_v11 = vadd.f32 %v1369_v38, %v544_v10 }
 0x182   : > { %v568_v12 = vmax.f32 %v545_v11, 0.0 }
 0x184   : > { %644 = vmatmul.f32.vlgmr.msrb.gmra.mxu3 %v568_v12 }
 0x187   : > { %v547_v13 = vpop.f32.mrf.mxu3 }
 0x188   : > { %v548_v14 = vadd.f32 %v1369_v38, %v547_v13 }
 0x18a   : > { %v569_v15 = vmax.f32 %v548_v14, 0.0 }
 0x18c   : > { %647 = vmatmul.f32.gmra.mxu3 %v569_v15 }
 0x18f   : > { %v550_v16 = vpop.f32.mrf.mxu3 }
 0x190   : > { %v551_v17 = vadd.f32 %v1369_v38, %v550_v16 }
 0x192   : > { %v570_v18 = vmax.f32 %v551_v17, 0.0 }
 0x194   : > { %650 = vmatmul.f32.gmra.mxu3 %v570_v18 }
 0x197   : > { %v553_v19 = vpop.f32.mrf.mxu3 }
 0x198   : > { %v554_v20 = vadd.f32 %v1369_v38, %v553_v19  ;;  %v865_v38 = vlaneseq }
 0x19a   : > { %v571_v21 = vmax.f32 %v554_v20, 0.0  ;;  %v1845_v41 = vand.u32 127, %v865_v38 }
 0x19c   : > { %653 = vmatmul.f32.gmra.mxu3 %v571_v21  ;;  %vm867_vm1 = vcmp.lt.s32.totalorder %v1845_v41, 16 }
 0x1a1   : > { %v609_v23 = vpop.f32.mrf.mxu2 }
 0x1a2   : > { %v610_v24 = vadd.f32 %v1836_v22, %v609_v23 }
 0x1a4   : > { %v657_v25 = vand.u32 2147483647, %v610_v24  ;;  %v721_v48 = vmax.f32 %v610_v24, 0.0  ;;  %vm817_vm2 = vcmp.ge.f32.partialorder %v610_v24, 0.0 }
 0x1a6   : > { %v673_v26 = vsub.f32 0.0, %v657_v25 }
 0x1a8   : > { %v689_v27 = vmul.f32 1.442695, %v673_v26 }
 0x1a9   : > { %v612_v28 = vpop.f32.mrf.mxu2 }
 0x1aa   : > { %1371 = vpow2.f32 %v689_v27  ;;  %v613_v29 = vadd.f32 %v1836_v22, %v612_v28 }
 0x1ac   : > { %v658_v30 = vand.u32 2147483647, %v613_v29  ;;  %v722_v62 = vmax.f32 %v613_v29, 0.0  ;;  %vm818_vm3 = vcmp.ge.f32.partialorder %v613_v29, 0.0 }
 0x1ae   : > { %v674_v31 = vsub.f32 0.0, %v658_v30 }
 0x1b0   : > { %v1372_v32 = vpop.eup %1371  ;;  %v691_v33 = vmul.f32 1.442695, %v674_v31 }
 0x1b1   : > { %v737_v34 = vadd.f32 1.0, %v1372_v32  ;;  %v615_v35 = vpop.f32.mrf.mxu2 }
 0x1b2   : > { %1373 = vpow2.f32 %v691_v33  ;;  %v1841_v37 = vadd.f32 %v1836_v22, %v615_v35 }
 0x1b3   : > { %1375 = vlog2.f32 %v737_v34 }
 0x1b4   : > { %1377 = vrcp.f32 %v737_v34  ;;  %v659_v39 = vand.u32 2147483647, %v1841_v37  ;;  %v723_v13 = vmax.f32 %v1841_v37, 0.0  ;;  %vm819_vm4 = vcmp.ge.f32.partialorder %v1841_v37, 0.0 }
 0x1b6   : > { %v675_v40 = vsub.f32 0.0, %v659_v39 }
 0x1b8   : > { %v1374_v42 = vpop.eup %1373  ;;  %v693_v43 = vmul.f32 1.442695, %v675_v40 }
 0x1b9   : > { %v1376_v44 = vpop.eup %1375  ;;  %v738_v45 = vadd.f32 1.0, %v1374_v42  ;;  %v618_v46 = vpop.f32.mrf.mxu2 }
 0x1ba   : > { %v1378_v47 = vpop.eup %1377  ;;  %v754_v36 = vmul.f32 0.6931472, %v1376_v44  ;;  %1379 = vpow2.f32 %v693_v43  ;;  %v1848_v49 = vadd.f32 %v1836_v22, %v618_v46 }
 0x1bb   : > { %v833_v50 = vsub.f32 1.0, %v1378_v47  ;;  %1381 = vlog2.f32 %v738_v45 }
 0x1bc   : > { %v785_v51 = vadd.f32 %v754_v36, %v721_v48  ;;  %1383 = vrcp.f32 %v738_v45  ;;  %v660_v52 = vand.u32 2147483647, %v1848_v49  ;;  %v724_v29 = vmax.f32 %v1848_v49, 0.0 }
 0x1bd   : > { %v849_v53 = vsel %vm817_vm2, %v1378_v47, %v833_v50  ;;  %vm820_vm5 = vcmp.ge.f32.partialorder %v1848_v49, 0.0 }
 0x1be   : > { %v870_v54 = vsel %vm867_vm1, %v785_v51, %v849_v53  ;;  %v676_v55 = vsub.f32 0.0, %v660_v52 }
 0x1bf   : > { %886 = vst [vmem:[%s1854_s24] sm:$0xff] %v870_v54 }
 0x1c0   : > { %v1380_v56 = vpop.eup %1379  ;;  %v695_v57 = vmul.f32 1.442695, %v676_v55 }
 0x1c1   : > { %v1382_v58 = vpop.eup %1381  ;;  %v739_v59 = vadd.f32 1.0, %v1380_v56  ;;  %v621_v60 = vpop.f32.mrf.mxu2 }
 0x1c2   : > { %v1384_v61 = vpop.eup %1383  ;;  %v756_v63 = vmul.f32 0.6931472, %v1382_v58  ;;  %1385 = vpow2.f32 %v695_v57  ;;  %v1858_v0 = vadd.f32 %v1836_v22, %v621_v60 }
 0x1c3   : > { %v834_v1 = vsub.f32 1.0, %v1384_v61  ;;  %1387 = vlog2.f32 %v739_v59 }
 0x1c4   : > { %v786_v2 = vadd.f32 %v756_v63, %v722_v62  ;;  %1389 = vrcp.f32 %v739_v59  ;;  %v661_v3 = vand.u32 2147483647, %v1858_v0  ;;  %v725_v46 = vmax.f32 %v1858_v0, 0.0 }
 0x1c5   : > { %v850_v4 = vsel %vm818_vm3, %v1384_v61, %v834_v1  ;;  %vm821_vm6 = vcmp.ge.f32.partialorder %v1858_v0, 0.0 }
 0x1c6   : > { %v871_v5 = vsel %vm867_vm1, %v786_v2, %v850_v4  ;;  %v677_v6 = vsub.f32 0.0, %v661_v3 }
 0x1c7   : > { %887 = vst [vmem:[%s1854_s24 + $0x8] sm:$0xff] %v871_v5 }
 0x1c8   : > { %v1386_v7 = vpop.eup %1385  ;;  %v697_v8 = vmul.f32 1.442695, %v677_v6 }
 0x1c9   : > { %v1388_v9 = vpop.eup %1387  ;;  %v740_v10 = vadd.f32 1.0, %v1386_v7  ;;  %v624_v11 = vpop.f32.mrf.mxu2 }
 0x1ca   : > { %v1390_v12 = vpop.eup %1389  ;;  %v758_v14 = vmul.f32 0.6931472, %v1388_v9  ;;  %1391 = vpow2.f32 %v697_v8  ;;  %v1866_v15 = vadd.f32 %v1836_v22, %v624_v11 }
 0x1cb   : > { %v835_v16 = vsub.f32 1.0, %v1390_v12  ;;  %1393 = vlog2.f32 %v740_v10 }
 0x1cc   : > { %v787_v17 = vadd.f32 %v758_v14, %v723_v13  ;;  %1395 = vrcp.f32 %v740_v10  ;;  %v662_v18 = vand.u32 2147483647, %v1866_v15  ;;  %v726_v60 = vmax.f32 %v1866_v15, 0.0 }
 0x1cd   : > { %v851_v19 = vsel %vm819_vm4, %v1390_v12, %v835_v16  ;;  %vm822_vm7 = vcmp.ge.f32.partialorder %v1866_v15, 0.0 }
 0x1ce   : > { %v872_v20 = vsel %vm867_vm1, %v787_v17, %v851_v19  ;;  %v678_v21 = vsub.f32 0.0, %v662_v18 }
 0x1cf   : > { %888 = vst [vmem:[%s1854_s24 + $0x10] sm:$0xff] %v872_v20 }
 0x1d0   : > { %v1392_v23 = vpop.eup %1391  ;;  %v699_v24 = vmul.f32 1.442695, %v678_v21 }
 0x1d1   : > { %v1394_v25 = vpop.eup %1393  ;;  %v741_v26 = vadd.f32 1.0, %v1392_v23  ;;  %v627_v27 = vpop.f32.mrf.mxu2 }
 0x1d2   : > { %v1396_v28 = vpop.eup %1395  ;;  %v760_v30 = vmul.f32 0.6931472, %v1394_v25  ;;  %1397 = vpow2.f32 %v699_v24  ;;  %v1875_v31 = vadd.f32 %v1836_v22, %v627_v27 }
 0x1d3   : > { %v836_v32 = vsub.f32 1.0, %v1396_v28  ;;  %1399 = vlog2.f32 %v741_v26 }
 0x1d4   : > { %v788_v33 = vadd.f32 %v760_v30, %v724_v29  ;;  %1401 = vrcp.f32 %v741_v26  ;;  %v663_v34 = vand.u32 2147483647, %v1875_v31  ;;  %v727_v11 = vmax.f32 %v1875_v31, 0.0 }
 0x1d5   : > { %v852_v35 = vsel %vm820_vm5, %v1396_v28, %v836_v32  ;;  %vm823_vm8 = vcmp.ge.f32.partialorder %v1875_v31, 0.0 }
 0x1d6   : > { %v873_v37 = vsel %vm867_vm1, %v788_v33, %v852_v35  ;;  %v679_v38 = vsub.f32 0.0, %v663_v34 }
 0x1d7   : > { %889 = vst [vmem:[%s1854_s24 + $0x18] sm:$0xff] %v873_v37 }
 0x1d8   : > { %v1398_v39 = vpop.eup %1397  ;;  %v701_v40 = vmul.f32 1.442695, %v679_v38 }
 0x1d9   : > { %v1400_v42 = vpop.eup %1399  ;;  %v742_v43 = vadd.f32 1.0, %v1398_v39  ;;  %v630_v44 = vpop.f32.mrf.mxu2 }
 0x1da   : > { %v1402_v45 = vpop.eup %1401  ;;  %v762_v47 = vmul.f32 0.6931472, %v1400_v42  ;;  %1403 = vpow2.f32 %v701_v40  ;;  %v1884_v48 = vadd.f32 %v1836_v22, %v630_v44 }
 0x1db   : > { %v837_v36 = vsub.f32 1.0, %v1402_v45  ;;  %1405 = vlog2.f32 %v742_v43 }
 0x1dc   : > { %v789_v49 = vadd.f32 %v762_v47, %v725_v46  ;;  %1407 = vrcp.f32 %v742_v43  ;;  %v664_v50 = vand.u32 2147483647, %v1884_v48  ;;  %v728_v27 = vmax.f32 %v1884_v48, 0.0 }
 0x1dd   : > { %v853_v51 = vsel %vm821_vm6, %v1402_v45, %v837_v36  ;;  %vm824_vm9 = vcmp.ge.f32.partialorder %v1884_v48, 0.0 }
 0x1de   : > { %v874_v52 = vsel %vm867_vm1, %v789_v49, %v853_v51  ;;  %v680_v53 = vsub.f32 0.0, %v664_v50 }
 0x1df   : > { %890 = vst [vmem:[%s1854_s24 + $0x20] sm:$0xff] %v874_v52 }
 0x1e0   : > { %v1404_v54 = vpop.eup %1403  ;;  %v703_v55 = vmul.f32 1.442695, %v680_v53 }
 0x1e1   : > { %v1406_v56 = vpop.eup %1405  ;;  %v743_v57 = vadd.f32 1.0, %v1404_v54  ;;  %v633_v58 = vpop.f32.mrf.mxu2 }
 0x1e2   : > { %v1408_v59 = vpop.eup %1407  ;;  %v764_v61 = vmul.f32 0.6931472, %v1406_v56  ;;  %1409 = vpow2.f32 %v703_v55  ;;  %v1893_v62 = vadd.f32 %v1836_v22, %v633_v58 }
 0x1e3   : > { %v838_v63 = vsub.f32 1.0, %v1408_v59  ;;  %1411 = vlog2.f32 %v743_v57 }
 0x1e4   : > { %v790_v0 = vadd.f32 %v764_v61, %v726_v60  ;;  %1413 = vrcp.f32 %v743_v57  ;;  %v665_v1 = vand.u32 2147483647, %v1893_v62  ;;  %v729_v44 = vmax.f32 %v1893_v62, 0.0 }
 0x1e5   : > { %v854_v2 = vsel %vm822_vm7, %v1408_v59, %v838_v63  ;;  %vm825_vm10 = vcmp.ge.f32.partialorder %v1893_v62, 0.0 }
 0x1e6   : > { %v875_v3 = vsel %vm867_vm1, %v790_v0, %v854_v2  ;;  %v681_v4 = vsub.f32 0.0, %v665_v1 }
 0x1e7   : > { %891 = vst [vmem:[%s1854_s24 + $0x28] sm:$0xff] %v875_v3 }
 0x1e8   : > { %v1410_v5 = vpop.eup %1409  ;;  %v705_v6 = vmul.f32 1.442695, %v681_v4 }
 0x1e9   : > { %v1412_v7 = vpop.eup %1411  ;;  %v744_v8 = vadd.f32 1.0, %v1410_v5  ;;  %v636_v9 = vpop.f32.mrf.mxu2 }
 0x1ea   : > { %v1414_v10 = vpop.eup %1413  ;;  %v766_v12 = vmul.f32 0.6931472, %v1412_v7  ;;  %1415 = vpow2.f32 %v705_v6  ;;  %v1902_v13 = vadd.f32 %v1836_v22, %v636_v9 }
 0x1eb   : > { %v839_v14 = vsub.f32 1.0, %v1414_v10  ;;  %1417 = vlog2.f32 %v744_v8 }
 0x1ec   : > { %v791_v15 = vadd.f32 %v766_v12, %v727_v11  ;;  %1419 = vrcp.f32 %v744_v8  ;;  %v666_v16 = vand.u32 2147483647, %v1902_v13  ;;  %v730_v57 = vmax.f32 %v1902_v13, 0.0 }
 0x1ed   : > { %v855_v17 = vsel %vm823_vm8, %v1414_v10, %v839_v14  ;;  %vm826_vm11 = vcmp.ge.f32.partialorder %v1902_v13, 0.0 }
 0x1ee   : > { %v876_v18 = vsel %vm867_vm1, %v791_v15, %v855_v17  ;;  %v682_v19 = vsub.f32 0.0, %v666_v16 }
 0x1ef   : > { %892 = vst [vmem:[%s1854_s24 + $0x30] sm:$0xff] %v876_v18 }
 0x1f0   : > { %v1416_v20 = vpop.eup %1415  ;;  %v707_v21 = vmul.f32 1.442695, %v682_v19 }
 0x1f1   : > { %v1418_v23 = vpop.eup %1417  ;;  %v745_v24 = vadd.f32 1.0, %v1416_v20  ;;  %v639_v25 = vpop.f32.mrf.mxu2 }
 0x1f2   : > { %v1420_v26 = vpop.eup %1419  ;;  %v768_v28 = vmul.f32 0.6931472, %v1418_v23  ;;  %1421 = vpow2.f32 %v707_v21  ;;  %v1911_v29 = vadd.f32 %v1836_v22, %v639_v25 }
 0x1f3   : > { %v840_v30 = vsub.f32 1.0, %v1420_v26  ;;  %1423 = vlog2.f32 %v745_v24 }
 0x1f4   : > { %v792_v31 = vadd.f32 %v768_v28, %v728_v27  ;;  %1425 = vrcp.f32 %v745_v24  ;;  %v667_v32 = vand.u32 2147483647, %v1911_v29  ;;  %v731_v5 = vmax.f32 %v1911_v29, 0.0 }
 0x1f5   : > { %v856_v33 = vsel %vm824_vm9, %v1420_v26, %v840_v30  ;;  %vm827_vm12 = vcmp.ge.f32.partialorder %v1911_v29, 0.0 }
 0x1f6   : > { %v877_v34 = vsel %vm867_vm1, %v792_v31, %v856_v33  ;;  %v683_v35 = vsub.f32 0.0, %v667_v32 }
 0x1f7   : > { %893 = vst [vmem:[%s1854_s24 + $0x38] sm:$0xff] %v877_v34 }
 0x1f8   : > { %v1422_v37 = vpop.eup %1421  ;;  %v709_v38 = vmul.f32 1.442695, %v683_v35 }
 0x1f9   : > { %v1424_v39 = vpop.eup %1423  ;;  %v746_v40 = vadd.f32 1.0, %v1422_v37  ;;  %v642_v42 = vpop.f32.mrf.mxu2 }
 0x1fa   : > { %v1426_v43 = vpop.eup %1425  ;;  %v770_v45 = vmul.f32 0.6931472, %v1424_v39  ;;  %1427 = vpow2.f32 %v709_v38  ;;  %v643_v46 = vadd.f32 %v1836_v22, %v642_v42 }
 0x1fb   : > { %v841_v47 = vsub.f32 1.0, %v1426_v43  ;;  %1429 = vlog2.f32 %v746_v40 }
 0x1fc   : > { %v793_v48 = vadd.f32 %v770_v45, %v729_v44  ;;  %1431 = vrcp.f32 %v746_v40  ;;  %v668_v36 = vand.u32 2147483647, %v643_v46  ;;  %v732_v18 = vmax.f32 %v643_v46, 0.0 }
 0x1fd   : > { %v857_v49 = vsel %vm825_vm10, %v1426_v43, %v841_v47  ;;  %vm828_vm13 = vcmp.ge.f32.partialorder %v643_v46, 0.0 }
 0x1fe   : > { %v878_v50 = vsel %vm867_vm1, %v793_v48, %v857_v49  ;;  %v684_v51 = vsub.f32 0.0, %v668_v36 }
 0x1ff   : > { %894 = vst [vmem:[%s1854_s24 + $0x40] sm:$0xff] %v878_v50 }
 0x200   : > { %v1428_v52 = vpop.eup %1427  ;;  %v711_v53 = vmul.f32 1.442695, %v684_v51 }
 0x201   : > { %v1430_v54 = vpop.eup %1429  ;;  %v747_v55 = vadd.f32 1.0, %v1428_v52 }
 0x202   : > { %v1432_v56 = vpop.eup %1431  ;;  %v772_v58 = vmul.f32 0.6931472, %v1430_v54  ;;  %1433 = vpow2.f32 %v711_v53 }
 0x203   : > { %v842_v59 = vsub.f32 1.0, %v1432_v56  ;;  %1435 = vlog2.f32 %v747_v55 }
 0x204   : > { %v794_v60 = vadd.f32 %v772_v58, %v730_v57  ;;  %1437 = vrcp.f32 %v747_v55 }
 0x205   : > { %v858_v61 = vsel %vm826_vm11, %v1432_v56, %v842_v59 }
 0x206   : > { %v879_v62 = vsel %vm867_vm1, %v794_v60, %v858_v61 }
 0x207   : > { %895 = vst [vmem:[%s1854_s24 + $0x48] sm:$0xff] %v879_v62  ;;  %v645_v63 = vpop.f32.mrf.mxu3 }
 0x208   : > { %v1434_v0 = vpop.eup %1433  ;;  %v646_v1 = vadd.f32 %v1836_v22, %v645_v63 }
 0x209   : > { %v1436_v2 = vpop.eup %1435  ;;  %v748_v3 = vadd.f32 1.0, %v1434_v0 }
 0x20a   : > { %v1438_v4 = vpop.eup %1437  ;;  %v774_v6 = vmul.f32 0.6931472, %v1436_v2  ;;  %v669_v7 = vand.u32 2147483647, %v646_v1  ;;  %v733_v42 = vmax.f32 %v646_v1, 0.0  ;;  %vm829_vm14 = vcmp.ge.f32.partialorder %v646_v1, 0.0 }
 0x20b   : > { %v843_v8 = vsub.f32 1.0, %v1438_v4  ;;  %1439 = vlog2.f32 %v748_v3 }
 0x20c   : > { %v795_v9 = vadd.f32 %v774_v6, %v731_v5  ;;  %1441 = vrcp.f32 %v748_v3  ;;  %v685_v10 = vsub.f32 0.0, %v669_v7 }
 0x20d   : > { %v859_v11 = vsel %vm827_vm12, %v1438_v4, %v843_v8 }
 0x20e   : > { %v880_v12 = vsel %vm867_vm1, %v795_v9, %v859_v11  ;;  %v713_v13 = vmul.f32 1.442695, %v685_v10 }
 0x20f   : > { %896 = vst [vmem:[%s1854_s24 + $0x50] sm:$0xff] %v880_v12  ;;  %v648_v14 = vpop.f32.mrf.mxu3 }
 0x210   : > { %1443 = vpow2.f32 %v713_v13  ;;  %v649_v15 = vadd.f32 %v1836_v22, %v648_v14 }
 0x211   : > { %v1440_v16 = vpop.eup %1439 }
 0x212   : > { %v1442_v17 = vpop.eup %1441  ;;  %v776_v19 = vmul.f32 0.6931472, %v1440_v16  ;;  %v670_v20 = vand.u32 2147483647, %v649_v15  ;;  %v734_v55 = vmax.f32 %v649_v15, 0.0  ;;  %vm830_vm15 = vcmp.ge.f32.partialorder %v649_v15, 0.0 }
 0x213   : > { %v844_v21 = vsub.f32 1.0, %v1442_v17 }
 0x214   : > { %v796_v23 = vadd.f32 %v776_v19, %v732_v18  ;;  %v686_v24 = vsub.f32 0.0, %v670_v20 }
 0x215   : > { %v860_v25 = vsel %vm828_vm13, %v1442_v17, %v844_v21 }
 0x216   : > { %v1444_v26 = vpop.eup %1443  ;;  %v881_v27 = vsel %vm867_vm1, %v796_v23, %v860_v25  ;;  %v715_v28 = vmul.f32 1.442695, %v686_v24 }
 0x217   : > { %897 = vst [vmem:[%s1854_s24 + $0x58] sm:$0xff] %v881_v27  ;;  %v749_v29 = vadd.f32 1.0, %v1444_v26  ;;  %v651_v30 = vpop.f32.mrf.mxu3 }
 0x218   : > { %1445 = vpow2.f32 %v715_v28  ;;  %v652_v31 = vadd.f32 %v1836_v22, %v651_v30 }
 0x219   : > { %1447 = vlog2.f32 %v749_v29 }
 0x21a   : > { %1449 = vrcp.f32 %v749_v29  ;;  %v671_v32 = vand.u32 2147483647, %v652_v31  ;;  %v735_v0 = vmax.f32 %v652_v31, 0.0  ;;  %vm831_vm0 = vcmp.ge.f32.partialorder %v652_v31, 0.0 }
 0x21c   : > { %v687_v33 = vsub.f32 0.0, %v671_v32 }
 0x21e   : > { %v1446_v34 = vpop.eup %1445  ;;  %v717_v35 = vmul.f32 1.442695, %v687_v33 }
 0x21f   : > { %v1448_v37 = vpop.eup %1447  ;;  %v750_v38 = vadd.f32 1.0, %v1446_v34  ;;  %v654_v39 = vpop.f32.mrf.mxu3 }
 0x220   : > { %v1450_v40 = vpop.eup %1449  ;;  %v778_v43 = vmul.f32 0.6931472, %v1448_v37  ;;  %1451 = vpow2.f32 %v717_v35  ;;  %v655_v44 = vadd.f32 %v1836_v22, %v654_v39 }
 0x221   : > { %v845_v45 = vsub.f32 1.0, %v1450_v40  ;;  %1453 = vlog2.f32 %v750_v38 }
 0x222   : > { %v797_v46 = vadd.f32 %v778_v43, %v733_v42  ;;  %1455 = vrcp.f32 %v750_v38  ;;  %v672_v47 = vand.u32 2147483647, %v655_v44  ;;  %v736_v8 = vmax.f32 %v655_v44, 0.0 }
 0x223   : > { %v861_v48 = vsel %vm829_vm14, %v1450_v40, %v845_v45  ;;  %vm832_vm2 = vcmp.ge.f32.partialorder %v655_v44, 0.0 }
 0x224   : > { %v882_v36 = vsel %vm867_vm1, %v797_v46, %v861_v48  ;;  %v688_v49 = vsub.f32 0.0, %v672_v47 }
 0x225   : > { %898 = vst [vmem:[%s1854_s24 + $0x60] sm:$0xff] %v882_v36 }
 0x226   : > { %v1452_v50 = vpop.eup %1451  ;;  %v719_v51 = vmul.f32 1.442695, %v688_v49 }
 0x227   : > { %v1454_v52 = vpop.eup %1453  ;;  %v751_v53 = vadd.f32 1.0, %v1452_v50 }
 0x228   : > { %v1456_v54 = vpop.eup %1455  ;;  %v780_v22 = vmul.f32 0.6931472, %v1454_v52  ;;  %1457 = vpow2.f32 %v719_v51 }
 0x229   : > { %v846_v56 = vsub.f32 1.0, %v1456_v54  ;;  %1459 = vlog2.f32 %v751_v53 }
 0x22a   : > { %v798_v57 = vadd.f32 %v780_v22, %v734_v55  ;;  %1461 = vrcp.f32 %v751_v53 }
 0x22b   : > { %v862_v58 = vsel %vm830_vm15, %v1456_v54, %v846_v56 }
 0x22c   : > { %v883_v59 = vsel %vm867_vm1, %v798_v57, %v862_v58 }
 0x22d   : > { %899 = vst [vmem:[%s1854_s24 + $0x68] sm:$0xff] %v883_v59 }
 0x22e   : > { %v1458_v60 = vpop.eup %1457 }
 0x22f   : > { %v1460_v61 = vpop.eup %1459  ;;  %v752_v62 = vadd.f32 1.0, %v1458_v60 }
 0x230   : > { %v1462_v63 = vpop.eup %1461  ;;  %v782_v1 = vmul.f32 0.6931472, %v1460_v61 }
 0x231   : > { %v847_v2 = vsub.f32 1.0, %v1462_v63  ;;  %1463 = vlog2.f32 %v752_v62 }
 0x232   : > { %v799_v3 = vadd.f32 %v782_v1, %v735_v0  ;;  %1465 = vrcp.f32 %v752_v62 }
 0x233   : > { %v863_v4 = vsel %vm831_vm0, %v1462_v63, %v847_v2 }
 0x234   : > { %v884_v5 = vsel %vm867_vm1, %v799_v3, %v863_v4 }
 0x235   : > { %900 = vst [vmem:[%s1854_s24 + $0x70] sm:$0xff] %v884_v5 }
 0x237   : > { %v1464_v6 = vpop.eup %1463 }
 0x238   : > { %v1466_v7 = vpop.eup %1465  ;;  %v784_v9 = vmul.f32 0.6931472, %v1464_v6 }
 0x239   : > { %v848_v10 = vsub.f32 1.0, %v1466_v7  ;;  %908 = sbr.rel (!%p1657_p4) target bundleno = 622 (0x26e), region = 56 }
 0x23a   : > { %v800_v11 = vadd.f32 %v784_v9, %v736_v8 }
 0x23b   : > { %v864_v12 = vsel %vm832_vm2, %v1466_v7, %v848_v10 }
 0x23c   : > { %v885_v13 = vsel %vm867_vm1, %v800_v11, %v864_v12 }
 0x23d   : > { %901 = vst [vmem:[%s1854_s24 + $0x78] sm:$0xff] %v885_v13 }
 0x23e   : > { %s2075_s15 = smov (!%p911_p11, %s910_s15), 16 }
 0x23f   : > { %s1217_s21 = sshll.u32 %s2075_s15, 3 }
 0x240   : > { %p1220_p12 = scmp.eq.s32.totalorder %s1217_s21, 0 }
 0x241   : > { %s1966_s23 = sshrl.u32 (!%p1220_p12), %s2075_s15, 4 }
 0x242   : > { %919 = sbr.rel (%p1220_p12) target bundleno = 622 (0x26e), region = 60  ;;  %p1221_p13 = scmp.le.s32.totalorder (!%p1220_p12), %s1966_s23, 0 }
 0x247   : > { %1137 = sbr.rel (%p1221_p13) target bundleno = 605 (0x25d), region = 137  ;;  %s2066_s27 = smov (!%p1221_p13), %s1960_s20 }
 0x248   : > { %s2067_s9 = smov (!%p1221_p13), %s1854_s24  ;;  %s1975_s17 = smov (!%p1221_p13), 0  }
 0x249   : > { %s1977_s26 = smov (!%p1221_p13), 0  }
 0x24c LB: >> { %v1012_v41 = vld [vmem:[%s1563_s9] sm:$0xff]  ;;  %v1014_v14 = vld [vmem:[%s1563_s9 + $0x8] sm:$0xff]  ;;  %v1016_v15 = vld [vmem:[%s1563_s9 + $0x10] sm:$0xff]  ;;  %s1044_s29 = sadd.s32 1, %s1567_s17  ;;  %s1006_s26 = sadd.s32 1, %s1571_s26   ;;  %s1571_s26 = sphi %s1977_s26, %s1006_s26   ;;  %s1567_s17 = sphi %s1975_s17, %s2070_s17   ;;  %s1563_s9 = sphi %s2067_s9, %s2069_s9   ;;  %s1559_s27 = sphi %s2066_s27, %s2068_s27  }
 0x24d   : >> { %1013 = vst [vmem:[%s1559_s27] sm:$0xff] %v1012_v41  ;;  %v1018_v16 = vld [vmem:[%s1563_s9 + $0x18] sm:$0xff]  ;;  %p1045_p0 = scmp.ge.s32.totalorder %s1044_s29, %s1966_s23  ;;  %v1020_v17 = vld [vmem:[%s1563_s9 + $0x20] sm:$0xff]  ;;  %v1022_v18 = vld [vmem:[%s1563_s9 + $0x28] sm:$0xff]  ;;  %p1005_p1 = scmp.ge.s32.totalorder %s1006_s26, %s1966_s23 }
 0x24e   : >> { %1015 = vst [vmem:[%s1559_s27 + $0x8] sm:$0xff] %v1014_v14  ;;  %v1024_v19 = vld [vmem:[%s1563_s9 + $0x30] sm:$0xff]  ;;  %v1026_v20 = vld [vmem:[%s1563_s9 + $0x38] sm:$0xff]  ;;  %v1028_v21 = vld [vmem:[%s1563_s9 + $0x40] sm:$0xff] }
 0x24f   : >> { %1017 = vst [vmem:[%s1559_s27 + $0x10] sm:$0xff] %v1016_v15  ;;  %s2077_s29 = smov (%p1045_p0, %s1044_s29), 0  ;;  %v1030_v23 = vld [vmem:[%s1563_s9 + $0x48] sm:$0xff]  ;;  %v1032_v24 = vld [vmem:[%s1563_s9 + $0x50] sm:$0xff]  ;;  %v1034_v25 = vld [vmem:[%s1563_s9 + $0x58] sm:$0xff] }
 0x250   : >> { %1019 = vst [vmem:[%s1559_s27 + $0x18] sm:$0xff] %v1018_v16  ;;  %s1222_s30 = sshll.u32 %s2077_s29, 7  ;;  %v1036_v26 = vld [vmem:[%s1563_s9 + $0x60] sm:$0xff]  ;;  %v1038_v27 = vld [vmem:[%s1563_s9 + $0x68] sm:$0xff]  ;;  %v1040_v28 = vld [vmem:[%s1563_s9 + $0x70] sm:$0xff]  ;;  %s2070_s17 = smov %s2077_s29 }
 0x251   : >> { %1021 = vst [vmem:[%s1559_s27 + $0x20] sm:$0xff] %v1020_v17  ;;  %s1049_s22 = scalar_lea.vmem %s1854_s24, %s1222_s30 [#allocation4]   ;;  %s1050_s10 = scalar_lea.vmem %s1960_s20, %s1222_s30   ;;  %v1042_v29 = vld [vmem:[%s1563_s9 + $0x78] sm:$0xff] }
 0x252   : >> { %1023 = vst [vmem:[%s1559_s27 + $0x28] sm:$0xff] %v1022_v18  ;;  %s2069_s9 = smov %s1049_s22 }
 0x253   : >> { %1025 = vst [vmem:[%s1559_s27 + $0x30] sm:$0xff] %v1024_v19 }
 0x254   : >> { %1027 = vst [vmem:[%s1559_s27 + $0x38] sm:$0xff] %v1026_v20 }
 0x255   : >> { %1029 = vst [vmem:[%s1559_s27 + $0x40] sm:$0xff] %v1028_v21 }
 0x256   : >> { %1031 = vst [vmem:[%s1559_s27 + $0x48] sm:$0xff] %v1030_v23 }
 0x257   : >> { %1033 = vst [vmem:[%s1559_s27 + $0x50] sm:$0xff] %v1032_v24 }
 0x258   : >> { %1035 = vst [vmem:[%s1559_s27 + $0x58] sm:$0xff] %v1034_v25  ;;  %1008 = sbr.rel (!%p1005_p1) target bundleno = 588 (0x24c), region = 143 }
 0x259   : >> { %1037 = vst [vmem:[%s1559_s27 + $0x60] sm:$0xff] %v1036_v26 }
 0x25a   : >> { %1039 = vst [vmem:[%s1559_s27 + $0x68] sm:$0xff] %v1038_v27 }
 0x25b   : >> { %1041 = vst [vmem:[%s1559_s27 + $0x70] sm:$0xff] %v1040_v28 }
 0x25c   : >> { %1043 = vst [vmem:[%s1559_s27 + $0x78] sm:$0xff] %v1042_v29  ;;  %s2068_s27 = smov %s1050_s10 }
 0x25d PF: > { %s2039_s11 = sand.u32 15, %s2075_s15   ;;  %s1233_s12 = sshll.u32 %s1966_s23, 7 }
 0x25e   : > { %s1055_s13 = scalar_lea.vmem %s1854_s24, %s1233_s12 [#allocation4]   ;;  %s1057_s14 = scalar_lea.vmem %s1960_s20, %s1233_s12  }
 0x25f   : > { %p1227_p2 = scmp.le.s32.totalorder %s2039_s11, 0 }
 0x260   : > { %s1573_s16 = smov (!%p1227_p2), %s1057_s14   ;;  %s1577_s18 = smov (!%p1227_p2), %s1055_s13  }
 0x261   : > { %1151 = sbr.rel (%p1227_p2) target bundleno = 622 (0x26e), region = 148  ;;  %s1581_s19 = smov (!%p1227_p2), 0  }
 0x262   : > { %s1585_s21 = smov (!%p1227_p2), 0  }
 0x266 LB: >> { %v1067_v30 = vld [vmem:[%s1579_s18] sm:$0xff]  ;;  %s1069_s15 = sadd.s32 1, %s1583_s19  ;;  %s1061_s21 = sadd.s32 1, %s1587_s21   ;;  %s1587_s21 = sphi %s1585_s21, %s1061_s21   ;;  %s1583_s19 = sphi %s1581_s19, %s1582_s19   ;;  %s1579_s18 = sphi %s1577_s18, %s1074_s18   ;;  %s1575_s16 = sphi %s1573_s16, %s1075_s16  }
 0x267   : >> { %1068 = vst [vmem:[%s1575_s16] sm:$0xff] %v1067_v30  ;;  %p1070_p3 = scmp.ge.s32.totalorder %s1069_s15, %s2039_s11  ;;  %p1060_p4 = scmp.ge.s32.totalorder %s1061_s21, %s2039_s11 }
 0x269   : >> { %s2079_s15 = smov (%p1070_p3, %s1069_s15), 0  ;;  %1063 = sbr.rel (!%p1060_p4) target bundleno = 614 (0x266), region = 154 }
 0x26a   : >> { %s1228_s24 = sshll.u32 %s2079_s15, 3  ;;  %s1582_s19 = smov %s2079_s15  }
 0x26b   : >> { %s1074_s18 = scalar_lea.vmem %s1055_s13, %s1228_s24 [#allocation4]   ;;  %s1075_s16 = scalar_lea.vmem %s1057_s14, %s1228_s24  }
 0x26e PF: > { %p15_p5 = scmp.ge.s32.totalorder %s1647_s28, 4   ;;  %s2071_s24 = smov %s1551_s25 }
 0x26f   : > { %s2072_s25 = smov %s1655_s8  ;;  %s2073_s26 = smov %s1647_s28 }
 0x270   :  { %17 = sbr.rel (!%p15_p5) target bundleno = 2 (0x2), region = 165 }
 0x275   :  { %1091 = vsyncpa [#allocation3], 1 }
 0x276   :  { %1093 = vsyncpa [#allocation3 + $0x1], 1 }

</bundles_post_ra>
